<compile_context>
chip_gen: v7x
topology: tpu7x:2x2x1
jax: 0.10.0
libtpu: 0.0.40
codegen_flags: <defaults>
</compile_context>

<pallas_src>
import functools

import jax
import jax.numpy as jnp
from jax.experimental import pallas as pl
from jax.experimental.pallas import tpu as pltpu


# ---------------------------------------------------------------------------
# Kernel 1: T5 RMS LayerNorm + fused QKV projection
# ---------------------------------------------------------------------------
def _rmsnorm_qkv_kernel(x_ref, wln_ref, wqkv_ref, qkv_ref, *, eps):
    x = x_ref[0]                                        # (TQ, D) f32
    w_ln = wln_ref[0]                                   # (D,)    f32
    var = jnp.mean(x * x, axis=-1, keepdims=True)       # f32 VPU/XLU
    xn = x * jax.lax.rsqrt(var + eps) * w_ln            # (TQ, D) f32
    qkv = jnp.dot(xn.astype(jnp.bfloat16), wqkv_ref[...],
                  preferred_element_type=jnp.float32)   # MXU bf16 -> f32 acc
    qkv_ref[0] = qkv.astype(qkv_ref.dtype)


def rmsnorm_qkv(hidden_states, w_ln, w_qkv, *, block_q, eps, vmem_limit_bytes):
    B, S, D = hidden_states.shape
    d3 = w_qkv.shape[1]
    return pl.pallas_call(
        functools.partial(_rmsnorm_qkv_kernel, eps=eps),
        out_shape=jax.ShapeDtypeStruct((B, S, d3), jnp.bfloat16),
        grid_spec=pltpu.PrefetchScalarGridSpec(
            num_scalar_prefetch=0,
            grid=(B, S // block_q),
            in_specs=[
                pl.BlockSpec((1, block_q, D), lambda b, qi: (b, qi, 0)),
                pl.BlockSpec((1, D), lambda b, qi: (0, 0)),
                pl.BlockSpec((D, d3), lambda b, qi: (0, 0)),
            ],
            out_specs=pl.BlockSpec((1, block_q, d3), lambda b, qi: (b, qi, 0)),
        ),
        compiler_params=pltpu.CompilerParams(
            dimension_semantics=("parallel", "parallel"),
            vmem_limit_bytes=vmem_limit_bytes),
    )(hidden_states, w_ln, w_qkv)


# ---------------------------------------------------------------------------
# Kernel 2: flash-style attention + per-head output projection + residual
# ---------------------------------------------------------------------------
def _flash_attn_o_kernel(hs_ref, q_ref, k_ref, v_ref, pb_ref, mask_ref, wo_ref,
                         out_ref, m_sc, l_sc, acc_sc, oacc_sc):
    h = pl.program_id(2)
    ki = pl.program_id(3)
    n_h = pl.num_programs(2)
    n_k = pl.num_programs(3)

    @pl.when(jnp.logical_and(h == 0, ki == 0))
    def _():
        oacc_sc[...] = jnp.zeros(oacc_sc.shape, jnp.float32)

    @pl.when(ki == 0)
    def _():
        m_sc[...] = jnp.full(m_sc.shape, -jnp.inf, jnp.float32)
        l_sc[...] = jnp.zeros(l_sc.shape, jnp.float32)
        acc_sc[...] = jnp.zeros(acc_sc.shape, jnp.float32)

    q = q_ref[0, 0]                      # (TQ, dh) bf16
    k = k_ref[0, 0]                      # (TK, dh) bf16
    v = v_ref[0, 0]                      # (TK, dh) bf16

    # scores: T5 has no 1/sqrt(d_head) scaling.  bf16 MXU, f32 accumulation.
    s = jax.lax.dot_general(q, k, (((1,), (1,)), ((), ())),
                            preferred_element_type=jnp.float32)   # (TQ, TK)
    # additive position bias + additive attention mask, added once per tile
    s = s + (pb_ref[0, 0] + mask_ref[0, 0, 0])

    # online softmax (f32 VPU/EUP math)
    m_prev = m_sc[...]
    m_new = jnp.maximum(m_prev, jnp.max(s, axis=-1, keepdims=True))
    alpha = jnp.exp(m_prev - m_new)
    p = jnp.exp(s - m_new)
    l_sc[...] = alpha * l_sc[...] + jnp.sum(p, axis=-1, keepdims=True)
    acc_sc[...] = alpha * acc_sc[...] + jnp.dot(
        p.astype(jnp.bfloat16), v, preferred_element_type=jnp.float32)
    m_sc[...] = m_new

    # per-head finalize: fold 1/l in once, project through this head's Wo slice
    @pl.when(ki == n_k - 1)
    def _():
        ctx = acc_sc[...] * pl.reciprocal(l_sc[...], approx=True)   # (TQ, dh)
        oacc_sc[...] += jnp.dot(ctx.astype(jnp.bfloat16), wo_ref[0],
                                preferred_element_type=jnp.float32)

    # last head + last key block: residual add + writeback
    @pl.when(jnp.logical_and(h == n_h - 1, ki == n_k - 1))
    def _():
        out_ref[0] = (hs_ref[0] + oacc_sc[...]).astype(out_ref.dtype)


def flash_attention_out(hidden_states, q, k, v, position_bias, attention_mask,
                        w_o_heads, *, block_q, block_k, vmem_limit_bytes):
    B, S, D = hidden_states.shape
    H, dh = q.shape[1], q.shape[-1]
    grid = (B, S // block_q, H, S // block_k)
    return pl.pallas_call(
        _flash_attn_o_kernel,
        out_shape=jax.ShapeDtypeStruct((B, S, D), hidden_states.dtype),
        grid_spec=pltpu.PrefetchScalarGridSpec(
            num_scalar_prefetch=0,
            grid=grid,
            in_specs=[
                pl.BlockSpec((1, block_q, D),
                             lambda b, qi, h, ki: (b, qi, 0)),        # residual
                pl.BlockSpec((1, 1, block_q, dh),
                             lambda b, qi, h, ki: (b, h, qi, 0)),     # Q
                pl.BlockSpec((1, 1, block_k, dh),
                             lambda b, qi, h, ki: (b, h, ki, 0)),     # K
                pl.BlockSpec((1, 1, block_k, dh),
                             lambda b, qi, h, ki: (b, h, ki, 0)),     # V
                pl.BlockSpec((1, 1, block_q, block_k),
                             lambda b, qi, h, ki: (b, h, qi, ki)),    # pos bias
                pl.BlockSpec((1, 1, 1, block_k),
                             lambda b, qi, h, ki: (b, 0, 0, ki)),     # mask
                pl.BlockSpec((1, dh, D),
                             lambda b, qi, h, ki: (h, 0, 0)),         # Wo[h]
            ],
            out_specs=pl.BlockSpec((1, block_q, D),
                                   lambda b, qi, h, ki: (b, qi, 0)),
            scratch_shapes=[
                pltpu.VMEM((block_q, 1), jnp.float32),    # m
                pltpu.VMEM((block_q, 1), jnp.float32),    # l
                pltpu.VMEM((block_q, dh), jnp.float32),   # per-head ctx acc
                pltpu.VMEM((block_q, D), jnp.float32),    # output acc
            ]),
        compiler_params=pltpu.CompilerParams(
            dimension_semantics=("parallel", "parallel",
                                 "arbitrary", "arbitrary"),
            vmem_limit_bytes=vmem_limit_bytes),
    )(hidden_states, q, k, v, position_bias, attention_mask, w_o_heads)


# ---------------------------------------------------------------------------
# Full T5 self-attention block (the wrapped module's forward)
# ---------------------------------------------------------------------------
def t5_self_attention_block(hidden_states, attention_mask, position_bias,
                            params, *, n_heads, eps=1e-6,
                            block_q=None, block_k=None,
                            vmem_limit_bytes=48 * 1024 * 1024):
    B, S, D = hidden_states.shape
    w_qkv = params['w_qkv']                       # (D, 3*d_inner) bf16
    w_o = params['w_o']                           # (d_inner, D)
    d_inner = w_o.shape[0]
    d_head = d_inner // n_heads

    bq = block_q if block_q is not None else (128 if S % 128 == 0 else S)
    bk = block_k if block_k is not None else (128 if S % 128 == 0 else S)

    qkv = rmsnorm_qkv(hidden_states, params['w_ln'], w_qkv,
                      block_q=bq, eps=eps, vmem_limit_bytes=vmem_limit_bytes)

    # layout plumbing outside the kernels (plain XLA): split Q/K/V per head
    q, k, v = jnp.split(qkv, 3, axis=-1)

    def to_heads(t):
        return t.reshape(B, S, n_heads, d_head).transpose(0, 2, 1, 3)

    qh, kh, vh = to_heads(q), to_heads(k), to_heads(v)   # (B, H, S, dh) bf16
    w_o_heads = w_o.reshape(n_heads, d_head, D).astype(jnp.bfloat16)

    return flash_attention_out(hidden_states, qh, kh, vh, position_bias,
                               attention_mask, w_o_heads,
                               block_q=bq, block_k=bk,
                               vmem_limit_bytes=vmem_limit_bytes)


class CheckpointWrapper:
    """JAX analogue of the PyTorch CheckpointWrapper.

    Forward semantics are identical with and without checkpointing; when
    use_checkpoint+training is requested we wrap in jax.checkpoint
    (rematerialization), which only affects backward memory behaviour.
    """

    def __init__(self, module_fn, use_checkpoint=False, training=False):
        self.module_fn = module_fn
        self.use_checkpoint = use_checkpoint
        self.training = training

    def __call__(self, hidden_states, attention_mask, position_bias, **kwargs):
        if self.use_checkpoint and self.training:
            # TODO(synk): gradients require a custom_vjp/backward Pallas kernel.
            fn = jax.checkpoint(
                lambda h, m, p: self.module_fn(h, m, p, **kwargs))
            out = fn(hidden_states, attention_mask, position_bias)
        else:
            out = self.module_fn(hidden_states, attention_mask,
                                 position_bias, **kwargs)
        # the wrapped T5 block returns a tuple (hidden_states, position_bias)
        return (out, position_bias)


# ---------------------------------------------------------------------------
# Pure-JAX f32 reference of the same forward (for a numeric sanity check)
# ---------------------------------------------------------------------------
def _reference_block(hidden_states, attention_mask, position_bias,
                     w_ln, wq, wk, wv, wo, n_heads, eps=1e-6):
    B, S, D = hidden_states.shape
    dh = wq.shape[1] // n_heads
    x = hidden_states
    var = jnp.mean(x * x, axis=-1, keepdims=True)
    xn = x * jax.lax.rsqrt(var + eps) * w_ln[0]
    q, k, v = xn @ wq, xn @ wk, xn @ wv

    def heads(t):
        return t.reshape(B, S, n_heads, dh).transpose(0, 2, 1, 3)

    qh, kh, vh = heads(q), heads(k), heads(v)
    scores = jnp.einsum('bhqd,bhkd->bhqk', qh, kh) + position_bias + attention_mask
    attn = jax.nn.softmax(scores, axis=-1)
    ctx = jnp.einsum('bhqk,bhkd->bhqd', attn, vh)
    ctx = ctx.transpose(0, 2, 1, 3).reshape(B, S, n_heads * dh)
    return x + ctx @ wo


if __name__ == "__main__":
    # small shapes consistent with a T5 self-attention block forward
    B, S, D, H = 2, 8, 32, 4
    d_head = D // H
    d_inner = H * d_head

    key = jax.random.PRNGKey(0)
    k_hs, k_pb, k_q, k_k, k_v, k_o = jax.random.split(key, 6)

    hidden_states = jax.random.normal(k_hs, (B, S, D), dtype=jnp.float32)

    # additive attention mask: last position of batch 1 masked out
    mask = jnp.zeros((B, 1, 1, S), dtype=jnp.float32)
    mask = mask.at[1, 0, 0, S - 1].set(-1e9)

    position_bias = 0.1 * jax.random.normal(k_pb, (B, H, S, S),
                                            dtype=jnp.float32)

    w_ln = jnp.ones((1, D), dtype=jnp.float32)
    wq = 0.05 * jax.random.normal(k_q, (D, d_inner), dtype=jnp.float32)
    wk = 0.05 * jax.random.normal(k_k, (D, d_inner), dtype=jnp.float32)
    wv = 0.05 * jax.random.normal(k_v, (D, d_inner), dtype=jnp.float32)
    wo = 0.05 * jax.random.normal(k_o, (d_inner, D), dtype=jnp.float32)

    params = {
        'w_ln': w_ln,
        'w_qkv': jnp.concatenate([wq, wk, wv], axis=1).astype(jnp.bfloat16),
        'w_o': wo,
    }

    module_fn = functools.partial(t5_self_attention_block,
                                  params=params, n_heads=H)
    wrapper = CheckpointWrapper(module_fn, use_checkpoint=False)

    out, pb_out = wrapper(hidden_states, mask, position_bias)
    out = jax.block_until_ready(out)

    assert out.shape == (B, S, D) and out.dtype == jnp.float32
    assert bool(jnp.all(jnp.isfinite(out)))

    ref = _reference_block(hidden_states, mask, position_bias,
                           w_ln, wq, wk, wv, wo, H)
    assert bool(jnp.allclose(out, ref, atol=3e-2, rtol=3e-2)), (
        float(jnp.max(jnp.abs(out - ref))))

    print("KERNEL_OK")
</pallas_src>

<mosaic_0001>
module attributes {stable_mosaic.version = 11 : i64} {
  func.func @_rmsnorm_qkv_kernel(%arg0: i32, %arg1: i32, %arg2: memref<1x8x32xf32, #tpu.memory_space<vmem>>, %arg3: memref<1x32xf32, #tpu.memory_space<vmem>>, %arg4: memref<32x96xbf16, #tpu.memory_space<vmem>>, %arg5: memref<1x8x96xbf16, #tpu.memory_space<vmem>>) attributes {dimension_semantics = [#tpu.dimension_semantics<parallel>, #tpu.dimension_semantics<parallel>], iteration_bounds = array<i64: 2, 1>, scalar_prefetch = 0 : i64, scratch_operands = 0 : i64, tpu.core_type = #tpu.core_type<tc>, window_params = [{transform_indices = @transform_0, window_bounds = array<i64: 1, 8, 32>}, {pipeline_mode = #tpu.pipeline_mode<synchronous>, transform_indices = @transform_1, window_bounds = array<i64: 1, 32>}, {pipeline_mode = #tpu.pipeline_mode<synchronous>, transform_indices = @transform_2, window_bounds = array<i64: 32, 96>}, {transform_indices = @transform_3, window_bounds = array<i64: 1, 8, 96>}]} {
    %c0 = arith.constant 0 : index
    %c0_0 = arith.constant 0 : index
    %c0_1 = arith.constant 0 : index
    %0 = vector.load %arg2[%c0, %c0_0, %c0_1] : memref<1x8x32xf32, #tpu.memory_space<vmem>>, vector<1x8x32xf32>
    %1 = vector.shape_cast %0 : vector<1x8x32xf32> to vector<8x32xf32>
    %c0_2 = arith.constant 0 : index
    %c0_3 = arith.constant 0 : index
    %2 = vector.load %arg3[%c0_2, %c0_3] : memref<1x32xf32, #tpu.memory_space<vmem>>, vector<1x32xf32>
    %3 = vector.shape_cast %2 : vector<1x32xf32> to vector<32xf32>
    %4 = arith.mulf %1, %1 : vector<8x32xf32>
    %cst = arith.constant dense<0.000000e+00> : vector<8xf32>
    %5 = vector.multi_reduction <add>, %4, %cst [1] : vector<8x32xf32> to vector<8xf32>
    %6 = vector.shape_cast %5 : vector<8xf32> to vector<8x1xf32>
    %cst_4 = arith.constant 3.200000e+01 : f32
    %7 = vector.broadcast %cst_4 : f32 to vector<8x1xf32>
    %8 = arith.divf %6, %7 : vector<8x1xf32>
    %cst_5 = arith.constant 9.99999997E-7 : f32
    %9 = vector.broadcast %cst_5 : f32 to vector<8x1xf32>
    %10 = arith.addf %8, %9 : vector<8x1xf32>
    %11 = math.rsqrt %10 : vector<8x1xf32>
    %12 = vector.broadcast %11 : vector<8x1xf32> to vector<8x32xf32>
    %13 = arith.mulf %1, %12 : vector<8x32xf32>
    %14 = vector.shape_cast %3 : vector<32xf32> to vector<1x32xf32>
    %15 = vector.broadcast %14 : vector<1x32xf32> to vector<8x32xf32>
    %16 = arith.mulf %13, %15 : vector<8x32xf32>
    %17 = arith.truncf %16 : vector<8x32xf32> to vector<8x32xbf16>
    %c0_6 = arith.constant 0 : index
    %c0_7 = arith.constant 0 : index
    %18 = vector.load %arg4[%c0_6, %c0_7] : memref<32x96xbf16, #tpu.memory_space<vmem>>, vector<32x96xbf16>
    %cst_8 = arith.constant dense<0.000000e+00> : vector<8x96xf32>
    %19 = tpu.matmul %17, %18, %cst_8 {dimension_numbers = #tpu.dot_dimension_numbers<[1], [0], [0], [1], [0, 0, 1, 1], [], []>} : vector<8x32xbf16>, vector<32x96xbf16>, vector<8x96xf32> -> vector<8x96xf32>
    %20 = arith.truncf %19 : vector<8x96xf32> to vector<8x96xbf16>
    %c0_9 = arith.constant 0 : index
    %c0_10 = arith.constant 0 : index
    %c0_11 = arith.constant 0 : index
    %21 = vector.load %arg5[%c0_9, %c0_10, %c0_11] : memref<1x8x96xbf16, #tpu.memory_space<vmem>>, vector<1x8x96xbf16>
    %22 = vector.shape_cast %21 : vector<1x8x96xbf16> to vector<8x96xbf16>
    %23 = vector.shape_cast %20 : vector<8x96xbf16> to vector<1x8x96xbf16>
    tpu.vector_store %arg5[%c0_9, %c0_10, %c0_11], %23 {strides = array<i32>} : memref<1x8x96xbf16, #tpu.memory_space<vmem>>, vector<1x8x96xbf16>,
    return
  }
  func.func @transform_0(%arg0: i32, %arg1: i32) -> (i32, i32, i32) {
    %c0_i32 = arith.constant 0 : i32
    %c0_i32_0 = arith.constant 0 : i32
    return %arg0, %arg1, %c0_i32 : i32, i32, i32
  }
  func.func @transform_1(%arg0: i32, %arg1: i32) -> (i32, i32) {
    %c0_i32 = arith.constant 0 : i32
    %c0_i32_0 = arith.constant 0 : i32
    %c0_i32_1 = arith.constant 0 : i32
    return %c0_i32, %c0_i32_0 : i32, i32
  }
  func.func @transform_2(%arg0: i32, %arg1: i32) -> (i32, i32) {
    %c0_i32 = arith.constant 0 : i32
    %c0_i32_0 = arith.constant 0 : i32
    %c0_i32_1 = arith.constant 0 : i32
    return %c0_i32, %c0_i32_0 : i32, i32
  }
  func.func @transform_3(%arg0: i32, %arg1: i32) -> (i32, i32, i32) {
    %c0_i32 = arith.constant 0 : i32
    %c0_i32_0 = arith.constant 0 : i32
    return %arg0, %arg1, %c0_i32 : i32, i32, i32
  }
}

</mosaic_0001>

<bundles_post_ra>
// kernel: tpu_custom_call.1
= control target key start
LH: loop header
LB: loop body
LE: loop exit
PB: predicated region body
PF: predicated region fallthrough
CT: control target
= control target key end

     0   :  { %8 = vsyncpa [#allocation3], 0  ;;  %s910_s0 = inlined_call_operand.hbm [shape: f32[2,8,32], index: 0, kind: input, shape index: {}]   ;;  %s911_s1 = inlined_call_operand.vmem [shape: f32[1,32], index: 1, kind: input, shape index: {}]   ;;  %s912_s2 = inlined_call_operand.hbm [shape: bf16[32,96], index: 2, kind: input, shape index: {}]   ;;  %s913_s3 = inlined_call_operand.hbm [shape: bf16[2,8,96], index: 3, kind: output, shape index: {}]  }
   0x1   :  { %10 = vsyncpa [#allocation3 + $0x1], 0 }
   0x2   :  { %11 = vsyncpa [#allocation6], 0 }
   0x3   :  { %12 = vsyncpa [#allocation4], 0 }
   0x4   :  { %14 = vsyncpa [#allocation4 + $0x1], 0  ;;  %s690_s12 = smov 0   ;;  %s692_s13 = smov 0  }
   0x5   :  { %s694_s14 = smov 0   ;;  %s696_s15 = smov 0  }
   0x6   :  { %s698_s16 = smov 0   ;;  %s700_s17 = smov 0  }
   0x7 LB: > { %s406_s18 = sadd.s32 4294967295, %s661_s17   ;;  %s407_s19 = sadd.s32 4294967294, %s661_s17   ;;  %s661_s17 = sphi %s700_s17, %s20_s17   ;;  %s657_s16 = sphi %s698_s16, %s937_s16   ;;  %s653_s15 = sphi %s696_s15, %s936_s15   ;;  %s649_s14 = sphi %s694_s14, %s935_s14   ;;  %s645_s13 = sphi %s692_s13, %s934_s13   ;;  %s641_s12 = sphi %s690_s12, %s933_s12  }
   0x8   : > { %p54_p0 = scmp.ne.s32.totalorder %s645_s13, %s641_s12  ;;  %p724_p1 = scmp.eq.s32.totalorder %s406_s18, 0 }
   0x9   : > { %p728_p2 = scmp.eq.s32.totalorder %s406_s18, 1  ;;  %p128_p3 = scmp.eq.s32.totalorder %s407_s19, 1 }
   0xa   : > { %s918_s20 = scalar_select %p724_p1, 1, 0 }
   0xb   : > { %s919_s21 = scalar_select %p728_p2, 1, 0 }
   0xc   : > { %p734_p4 = por %p724_p1, %p54_p0  ;;  %p408_p5 = scmp.ge.s32.totalorder %s661_s17, 1 }
   0xd   : > { %p739_p6 = por %p128_p3, %p54_p0  ;;  %p135_p7 = scmp.lt.s32.totalorder %s661_s17, 3 }
   0xe   : > { %s920_s22 = scalar_select %p734_p4, 1, 0 }
   0xf   : > { %s921_s23 = scalar_select %p739_p6, 1, 0 }
  0x10   : > { %p744_p8 = pnand %p408_p5, %p135_p7  ;;  %s663_s25 = smov [#allocation5]  }
  0x11   : > { %s150_s26 = sshll.u32 %s663_s25, 4  ;;  %s32_s28 = sadd.s32 1, %s657_s16  ;;  %s151_s26 = int_to_ptr.vmem [resolvable:$true] %s150_s26 }
  0x12   : > { %s922_s24 = scalar_select %p744_p8, 1, 0 }
  0x13   : > { %p444_p9 = pneg %p744_p8  ;;  %s517_s4 = scalar_lea.hbm %s912_s2, 256 }
  0x14   : > { %p518_p12 = scmp.ne.s32.totalorder %s912_s2, %s517_s4  ;;  %p524_p5 = scmp.lt.u32.totalorder %s517_s4, %s912_s2 }
  0x15   : > { %p753_p11 = pnand %p444_p9, %p724_p1 }
  0x17   : > { %p519_p13 = pneg %p753_p11 }
  0x19   : > { %p520_p0 = pnand %p519_p13, %p518_p12 }
  0x1b   : > { %p521_p3 = pneg %p520_p0 }
  0x1d   : > { %p526_p7 = pnand %p524_p5, %p521_p3 }
  0x1f   : > { %529 = shalt.err (!%p526_p7)
}
  0x20   : > { %s530_s9 = scalar_lea.vmem %s151_s26, 256  ;;  %p538_p1 = scmp.lt.s32.totalorder %s151_s26, %s151_s26 }
  0x21   : > { %p531_p9 = scmp.ne.s32.totalorder %s151_s26, %s530_s9  ;;  %p539_p4 = scmp.lt.s32.totalorder %s530_s9, %s530_s9 }
  0x23   : > { %p533_p10 = pnand %p531_p9, %p519_p13  ;;  %p540_p8 = por %p539_p4, %p538_p1 }
  0x25   : > { %p534_p6 = pneg %p533_p10 }
  0x27   : > { %p541_p2 = pnand %p540_p8, %p534_p6 }
  0x29   : > { %544 = shalt.err (!%p541_p2)
}
  0x2a   : > { %s664_s10 = smov 64   ;;  %s665_s11 = smov 4  }
  0x2b   : > { %447 = dma.hbm_to_vmem [thread:$0]  (!%p753_p11), %s912_s2, 256, %s151_s26, [#allocation6], %s664_s10, %s664_s10, %s665_s11  }
  0x2c   : > { %p34_p1 = scmp.ge.s32.totalorder %s32_s28, 2  ;;  %s41_s25 = sadd.s32 1, %s649_s14 }
  0x2d   : > { %p48_p2 = scmp.ne.s32.totalorder %s649_s14, %s645_s13  ;;  %p49_p4 = scmp.eq.s32.totalorder %s661_s17, 0 }
  0x2e   : > { %s939_s28 = smov (%p34_p1, %s32_s28), 0  ;;  %p925_p8 = scmp.ne.s32.totalorder %s919_s21, 0 }
  0x2f   : > { %p780_p6 = por %p49_p4, %p48_p2  ;;  %s36_s27 = ssub.s32 %s657_s16, %s939_s28 }
  0x30   : > { %p786_p10 = por %p925_p8, %p48_p2  ;;  %p457_p12 = scmp.lt.s32.totalorder %s661_s17, 2 }
  0x31   : > { %p39_p11 = scmp.eq.s32.totalorder %s36_s27, 0  ;;  %s164_s26 = sand.u32 1, %s649_s14  }
  0x32   : > { %s411_s4 = sshll.u32 %s164_s26, 3  ;;  %s412_s6 = sshll.u32 %s657_s16, 7 }
  0x33   : > { %s795_s5 = scalar_select %p39_p11, %s649_s14, %s41_s25  }
  0x34   : > { %s801_s9 = scalar_lea.hbm %s910_s0, %s412_s6  ;;  %s168_s21 = scalar_lea.vmem [#allocation2], %s411_s4 }
  0x35   : > { %s176_s10 = sshll.u32 %s168_s21, 4  ;;  %p807_p13 = pnand %p457_p12, %p780_p6  ;;  %s803_s10 = int_to_ptr.vmem [resolvable:$true] %s176_s10 }
  0x36   : > { %s165_s18 = scalar_lea.sflag [#allocation3], %s164_s26  ;;  %s545_s19 = scalar_lea.hbm %s801_s9, 128 }
  0x37   : > { %p546_p0 = scmp.ne.s32.totalorder %s801_s9, %s545_s19  ;;  %p547_p3 = pneg %p807_p13 }
  0x38   : > { %s550_s4 = scalar_lea.hbm %s910_s0, 256  ;;  %p551_p9 = scmp.lt.u32.totalorder %s801_s9, %s910_s0 }
  0x39   : > { %p548_p5 = pnand %p547_p3, %p546_p0  ;;  %p552_p1 = scmp.lt.u32.totalorder %s550_s4, %s545_s19 }
  0x3a   : > { %p554_p4 = scmp.lt.u32.totalorder %s545_s19, %s801_s9 }
  0x3b   : > { %p549_p7 = pneg %p548_p5  ;;  %p553_p2 = por %p552_p1, %p551_p9 }
  0x3d   : > { %p555_p6 = por %p554_p4, %p553_p2 }
  0x3f   : > { %p556_p8 = pnand %p555_p6, %p549_p7 }
  0x41   : > { %559 = shalt.err (!%p556_p8)
}
  0x42   : > { %s560_s26 = scalar_lea.vmem %s803_s10, 128  ;;  %s666_s7 = smov [#allocation2]  }
  0x43   : > { %p561_p12 = scmp.ne.s32.totalorder %s803_s10, %s560_s26  ;;  %s565_s8 = sshll.u32 %s666_s7, 4  ;;  %s566_s8 = int_to_ptr.vmem [resolvable:$false] %s565_s8 }
  0x44   : > { %s567_s21 = scalar_lea.vmem %s566_s8, 256  ;;  %p568_p5 = scmp.lt.s32.totalorder %s803_s10, %s566_s8 }
  0x45   : > { %p563_p11 = pnand %p561_p12, %p547_p3  ;;  %p569_p9 = scmp.lt.s32.totalorder %s567_s21, %s560_s26 }
  0x47   : > { %p564_p0 = pneg %p563_p11  ;;  %p570_p1 = por %p569_p9, %p568_p5 }
  0x49   : > { %p571_p2 = pnand %p570_p1, %p564_p0 }
  0x4b   : > { %574 = shalt.err (!%p571_p2)
}
  0x4c   : > { %451 = dma.hbm_to_vmem [thread:$0]  (!%p807_p13), %s801_s9, 128, %s803_s10, %s165_s18  }
  0x4d   : > { %p928_p7 = scmp.ne.s32.totalorder %s922_s24, 0 }
  0x4e   : > { %s839_s19 = sand.u32 (!%p928_p7), 1, %s645_s13   ;;  %p929_p3 = scmp.ne.s32.totalorder (!%p928_p7), %s920_s22, 0 }
  0x4f   : > { %185 = sbr.rel (%p928_p7) target bundleno = 485 (0x1e5), region = 32  ;;  %s414_s25 = sshll.u32 (!%p928_p7), %s839_s19, 3 }
  0x50   : > { %s188_s27 = scalar_lea.sflag (!%p928_p7), [#allocation3], %s839_s19  ;;  %s191_s4 = scalar_lea.vmem (!%p928_p7), [#allocation2], %s414_s25 }
  0x56   : > { %628 = dma.done.wait (%p929_p3), %s188_s27, 128  }
  0x57   : > { %630 = vsyncadd (%p929_p3), %s188_s27, 4294967168  ;;  %p930_p4 = scmp.ne.s32.totalorder %s918_s20, 0 }
  0x59   : > { %632 = dma.done.wait (%p930_p4), [#allocation6], 256  }
  0x5a   : > { %634 = vsyncadd (%p930_p4), [#allocation6], 4294967040  ;;  %v219_v0 = vld [vmem:[%s191_s4] sm:$0xff]  ;;  %vm222_vm0 = vcmask 261120   ;;  %v513_v3 = vld [vmem:[#allocation5] sm:$0xff]   ;;  %v667_v4 = vmov 0.0  }
  0x5b   : > { %v221_v1 = vmul.f32 %v219_v0, %v219_v0  ;;  %428 = vmatprep.subr.bf16.mxu0 %v667_v4  ;;  %vm668_vm1 = vmmov 0   ;;  %v514_v5 = vld [vmem:[#allocation5 + $0x8] sm:$0xff]   ;;  %v417_v10 = vld [vmem:[%s911_s1] ss:$0 sm:$0xff]  ;;  %s416_s24 = sshll.u32 %s839_s19, 2  ;;  %s422_s9 = sshll.u32 %s653_s15, 6 }
  0x5c   : > { %432 = vmatprep.mubr.msk.bf16.mxu0 %vm668_vm1, %v667_v4  ;;  %429 = vmatpush3.bf16.msra.mxu0 %v513_v3  ;;  %s217_s10 = scalar_lea.vmem [#allocation7], %s416_s24  ;;  %vm299_vm2 = vcmask 781312   ;;  %s861_s6 = scalar_lea.hbm %s913_s3, %s422_s9 }
  0x5d   : > { %v223_v2 = vsel %vm222_vm0, %v221_v1, 0.0  ;;  %430 = vmatprep.subr.bf16.mxu0 %v667_v4  ;;  %s316_s11 = sshll.u32 %s217_s10, 4  ;;  %s302_s15 = scalar_lea.sflag [#allocation4], %s839_s19  ;;  %s863_s11 = int_to_ptr.vmem [resolvable:$true] %s316_s11 }
  0x5e   : > { %224 = vadd.xlane.f32.xlu0 %v223_v2  ;;  %s575_s26 = scalar_lea.vmem %s863_s11, 64  ;;  %s669_s7 = smov [#allocation7]  }
  0x5f   : > { %p576_p13 = scmp.ne.s32.totalorder %s863_s11, %s575_s26  ;;  %s579_s8 = sshll.u32 %s669_s7, 4  ;;  %s580_s8 = int_to_ptr.vmem [resolvable:$false] %s579_s8 }
  0x60   : > { %431 = vmatpush3.bf16.msra.mxu0 %v514_v5  ;;  %s581_s21 = scalar_lea.vmem %s580_s8, 128  ;;  %p582_p12 = scmp.lt.s32.totalorder %s863_s11, %s580_s8 }
  0x61   : > { %p577_p6 = pnand %p576_p13, %p786_p10  ;;  %p583_p11 = scmp.lt.s32.totalorder %s581_s21, %s575_s26 }
  0x63   : > { %p578_p8 = pneg %p577_p6  ;;  %p584_p0 = por %p583_p11, %p582_p12 }
  0x65   : > { %p585_p5 = pnand %p584_p0, %p578_p8 }
  0xeb   : > { %v225_v6 = vpop.xlane.xlu0 %224 }
  0xec   : > { %v227_v7 = vmul.f32 0.03125, %v225_v6 }
  0xee   : > { %v228_v8 = vadd.f32 1e-06, %v227_v7 }
  0xf0   : > { %515 = vrsqrt.f32 %v228_v8 }
  0xfa   : > { %v516_v9 = vpop.eup %515 }
  0xfb   : > { %v230_v11 = vmul.f32 %v516_v9, %v219_v0 }
  0xfd   : > { %v237_v12 = vmul.f32 %v417_v10, %v230_v11 }
  0xff   : > { %v238_v13 = vpack.c.bf16 %v237_v12, %v237_v12 }
 0x101   : > { %433 = vmatmul.mubr.msk.bf16.vlgmr.msra.gmra.mrb[0].mxu0 %vm222_vm0, %v238_v13 }
 0x1d4   : > { %v292_v14 = vpop.f32.mrb[0].mxu0 }
 0x1d5   : > { %v298_v15 = vpack.c.bf16 %v292_v14, %v292_v14  ;;  %v434_v16 = vpop.f32.mrb[1].mxu0 }
 0x1d6   : > { %v295_v17 = vpop.f32.mrb[2].mxu0 }
 0x1d7   : > { %v435_v18 = vpop.f32.mrb[3].mxu0  ;;  %300 = vst.msk [vmem:[%s217_s10] sm:$0xf] %vm299_vm2, %v298_v15 }
 0x1d8   : > { %588 = shalt.err (!%p585_p5)
}
 0x1d9   : > { %s589_s19 = scalar_lea.hbm %s861_s6, 64  ;;  %s593_s4 = scalar_lea.hbm %s913_s3, 128 }
 0x1da   : > { %p590_p9 = scmp.ne.s32.totalorder %s861_s6, %s589_s19  ;;  %p594_p7 = scmp.lt.u32.totalorder %s861_s6, %s913_s3 }
 0x1db   : > { %p595_p3 = scmp.lt.u32.totalorder %s593_s4, %s589_s19  ;;  %p597_p13 = scmp.lt.u32.totalorder %s589_s19, %s861_s6 }
 0x1dc   : > { %p591_p1 = pnand %p590_p9, %p786_p10 }
 0x1dd   : > { %p596_p4 = por %p595_p3, %p594_p7 }
 0x1de   : > { %p592_p2 = pneg %p591_p1 }
 0x1df   : > { %p598_p6 = por %p597_p13, %p596_p4 }
 0x1e1   : > { %p599_p8 = pnand %p598_p6, %p592_p2 }
 0x1e3   : > { %602 = shalt.err (!%p599_p8)
}
 0x1e4   : > { %442 = dma.vmem_to_hbm [thread:$0]  (%p786_p10), %s863_s11, 64, %s861_s6, %s302_s15  }
 0x1e5 PF: > { %s328_s24 = sand.u32 1, %s641_s12   ;;  %p931_p12 = scmp.ne.s32.totalorder %s921_s23, 0 }
 0x1e6   : > { %p932_p11 = scmp.ge.s32.totalorder %s661_s17, 2  ;;  %s329_s9 = scalar_lea.sflag [#allocation4], %s328_s24 }
 0x1e8   : > { %p453_p0 = pnand %p932_p11, %p931_p12 }
 0x1ea   : > { %636 = dma.done.wait (!%p453_p0), %s329_s9, 64  }
 0x1eb   : > { %638 = vsyncadd (!%p453_p0), %s329_s9, 4294967232  ;;  %s20_s17 = sadd.s32 1, %s661_s17   ;;  %s933_s12 = smov %s645_s13 }
 0x1ec   : > { %p17_p5 = scmp.ge.s32.totalorder %s20_s17, 4   ;;  %s934_s13 = smov %s649_s14 }
 0x1ed   : > { %s935_s14 = smov %s795_s5  ;;  %s936_s15 = smov %s657_s16 }
 0x1ee   : > { %s937_s16 = smov %s939_s28  ;;  %19 = sbr.rel (!%p17_p5) target bundleno = 7 (0x7), region = 81 }
 0x1f5   :  { %334 = vsyncpa [#allocation3], 1 }
 0x1f6   :  { %336 = vsyncpa [#allocation3 + $0x1], 1 }
 0x1f7   :  { %337 = vsyncpa [#allocation6], 1 }
 0x1f8   :  { %338 = vsyncpa [#allocation4], 1 }
 0x1f9   :  { %340 = vsyncpa [#allocation4 + $0x1], 1 }

</bundles_post_ra>
